<compile_context>
chip_gen: v6e
topology: v6e:2x2x1
jax: 0.10.0
libtpu: 0.0.40
codegen_flags: <defaults>
</compile_context>

<pallas_src>
import functools

import jax
import jax.numpy as jnp
from jax.experimental import pallas as pl
from jax.experimental.pallas import tpu as pltpu


# ---------------------------------------------------------------------------
# Kernel
# ---------------------------------------------------------------------------
def residual_block_kernel(x_ref, w1_ref, b1_ref, w2_ref, b2_ref, o_ref):
    # Linear 1 on the MXU (bf16 operands, f32 accumulation); bias + ReLU in f32.
    h = jnp.dot(x_ref[...].astype(jnp.bfloat16), w1_ref[...],
                preferred_element_type=jnp.float32)
    h = jnp.maximum(h + b1_ref[...], 0.0)
    # Linear 2 on the MXU.
    y = jnp.dot(h.astype(jnp.bfloat16), w2_ref[...],
                preferred_element_type=jnp.float32)
    # Residual add in f32; re-read x_ref here instead of keeping an f32 copy
    # of x alive across both matmuls.
    o_ref[...] = (x_ref[...].astype(jnp.float32) + y + b2_ref[...]).astype(o_ref.dtype)


# ---------------------------------------------------------------------------
# Sizing helpers
# ---------------------------------------------------------------------------
def _vmem_limit_bytes():
    """Per-generation VMEM cap: ~85% of physical VMEM, never above ~110 MiB."""
    try:
        capacity = int(pltpu.get_tpu_info().vmem_capacity_bytes)
    except Exception:  # hardware query fallback only; never masks kernel errors
        capacity = 64 * 1024 * 1024  # conservative: v7x per-TC VMEM
    return min(int(capacity * 0.85), 110 * 1024 * 1024)


def _probe_kernel(a_ref, w_ref, o_ref):
    o_ref[...] = a_ref[...] + w_ref[...]


@functools.lru_cache(maxsize=None)
def _single_buffered_weights_supported():
    """One-time capability probe: does pipeline_mode=pl.Buffered(1) lower?

    Uses a tiny throwaway kernel, so genuine shape/lowering errors in the
    real kernel are never masked and the real kernel is compiled only once.
    """
    if not hasattr(pl, "Buffered"):
        return False
    try:
        fn = pl.pallas_call(
            _probe_kernel,
            out_shape=jax.ShapeDtypeStruct((16, 128), jnp.float32),
            grid_spec=pltpu.PrefetchScalarGridSpec(
                num_scalar_prefetch=0,
                grid=(2,),
                in_specs=[
                    pl.BlockSpec((8, 128), lambda i: (i, 0)),
                    pl.BlockSpec((8, 128), lambda i: (0, 0),
                                 pipeline_mode=pl.Buffered(1)),
                ],
                out_specs=pl.BlockSpec((8, 128), lambda i: (i, 0)),
            ),
        )
        jax.jit(fn).lower(
            jax.ShapeDtypeStruct((16, 128), jnp.float32),
            jax.ShapeDtypeStruct((8, 128), jnp.float32),
        ).compile()
        return True
    except Exception:  # capability probe only
        return False


def _choose_tile_m(M, F, vmem_limit, single_buffer_weights):
    """Largest row tile that fits the VMEM budget, with >= 2 grid steps."""
    if M <= 8:
        return M  # one full-extent row block (block dim == array dim)
    weight_buffers = 1 if single_buffer_weights else 2
    weight_bytes = 2 * F * F * 2 * weight_buffers          # w1 + w2, bf16
    # Per row: x/out double-buffered f32 blocks (4*F*4) + f32 h/y and the
    # bf16 casts (~3*F*4).
    per_row_bytes = 7 * F * 4
    headroom = 2 * 1024 * 1024                              # compiler scratch
    avail = max(vmem_limit - weight_bytes - headroom, 0)
    tile = int(min(avail // per_row_bytes, 1024, M))
    tile = max((tile // 8) * 8, 8)
    # >= 2 grid steps so the "parallel" row axis shards across both v7x TCs;
    # >= 4 while the tile stays large, to keep the x/out DMA pipeline busy.
    while tile > 8 and (pl.cdiv(M, tile) < 2
                        or (pl.cdiv(M, tile) < 4 and tile > 256)):
        tile = max(((tile // 2) // 8) * 8, 8)
    return tile


# ---------------------------------------------------------------------------
# pallas_call builder + wrappers
# ---------------------------------------------------------------------------
def _build_call(M, F, tile_m, out_dtype, vmem_limit, single_buffer_weights):
    grid = (pl.cdiv(M, tile_m),)

    def weight_spec():
        if single_buffer_weights:
            # Grid-invariant weight: single-buffer to halve resident VMEM.
            return pl.BlockSpec((F, F), lambda i: (0, 0),
                                pipeline_mode=pl.Buffered(1))
        return pl.BlockSpec((F, F), lambda i: (0, 0))

    cost = pl.CostEstimate(
        flops=4 * M * F * F,                                 # two M x F x F matmuls
        transcendentals=0,
        bytes_accessed=2 * M * F * 4 + 2 * F * F * 2 + 2 * F * 4,
    )

    return pl.pallas_call(
        residual_block_kernel,
        out_shape=jax.ShapeDtypeStruct((M, F), out_dtype),
        grid_spec=pltpu.PrefetchScalarGridSpec(
            num_scalar_prefetch=0,
            grid=grid,
            in_specs=[
                pl.BlockSpec((tile_m, F), lambda i: (i, 0)),   # x row tile
                weight_spec(),                                  # w1 (resident)
                pl.BlockSpec((1, F), lambda i: (0, 0)),         # b1
                weight_spec(),                                  # w2 (resident)
                pl.BlockSpec((1, F), lambda i: (0, 0)),         # b2
            ],
            out_specs=pl.BlockSpec((tile_m, F), lambda i: (i, 0)),
        ),
        compiler_params=pltpu.CompilerParams(
            dimension_semantics=("parallel",),
            vmem_limit_bytes=vmem_limit,
        ),
        cost_estimate=cost,
    )


def prepare_residual_block_params(w1, b1, w2, b2):
    """One-time parameter prep (hoisted out of the per-call path).

    w1 / w2 must be in (in_features, out_features) layout, i.e. the transpose
    of PyTorch's nn.Linear.weight. Weights become bf16 for the MXU; biases
    become f32 (1, F) rows for lane-wise broadcast in the kernel.
    """
    F = w1.shape[0]
    assert w1.shape == (F, F) and w2.shape == (F, F)
    assert b1.shape == (F,) and b2.shape == (F,)
    return {
        "w1": jnp.asarray(w1, jnp.bfloat16),
        "b1": jnp.asarray(b1, jnp.float32).reshape(1, F),
        "w2": jnp.asarray(w2, jnp.bfloat16),
        "b2": jnp.asarray(b2, jnp.float32).reshape(1, F),
    }


def residual_block(x, params, *, tile_m=None):
    """x: (M, F) activations; params from prepare_residual_block_params."""
    M, F = x.shape
    assert params["w1"].shape == (F, F), "feature dim mismatch with params"

    single_buf = _single_buffered_weights_supported()
    vmem_limit = _vmem_limit_bytes()
    if tile_m is None:
        tile_m = _choose_tile_m(M, F, vmem_limit, single_buf)
    else:
        tile_m = min(int(tile_m), M)
        if tile_m < M:
            tile_m = max((tile_m // 8) * 8, 8)

    call = _build_call(M, F, tile_m, x.dtype, vmem_limit, single_buf)
    return call(x, params["w1"], params["b1"], params["w2"], params["b2"])


def residual_block_ref(x, w1, b1, w2, b2):
    h = jnp.maximum(x @ w1 + b1, 0.0)
    return x + (h @ w2 + b2)


# ---------------------------------------------------------------------------
# Demo / self-test
# ---------------------------------------------------------------------------
if __name__ == "__main__":
    key = jax.random.PRNGKey(0)
    batch, in_features = 16, 32

    k_x, k_w1, k_b1, k_w2, k_b2 = jax.random.split(key, 5)
    x = jax.random.normal(k_x, (batch, in_features), dtype=jnp.float32)

    # nn.Linear-style uniform(-1/sqrt(F), 1/sqrt(F)) init; weights generated
    # directly in the (in, out) layout (PyTorch stores (out, in)).
    bound = 1.0 / (in_features ** 0.5)
    w1 = jax.random.uniform(k_w1, (in_features, in_features), jnp.float32, -bound, bound)
    b1 = jax.random.uniform(k_b1, (in_features,), jnp.float32, -bound, bound)
    w2 = jax.random.uniform(k_w2, (in_features, in_features), jnp.float32, -bound, bound)
    b2 = jax.random.uniform(k_b2, (in_features,), jnp.float32, -bound, bound)

    params = prepare_residual_block_params(w1, b1, w2, b2)   # one-time prep

    # At batch=16 the auto tiler picks tile_m=8 -> a 2-step pipelined grid.
    out = residual_block(x, params)
    out = jax.block_until_ready(out)

    ref = residual_block_ref(x, w1, b1, w2, b2)
    assert out.shape == x.shape and out.dtype == x.dtype
    # bf16 MXU operands with f32 accumulation -> loosened tolerance vs f32 ref.
    assert jnp.allclose(out, ref, atol=5e-2, rtol=5e-2), "mismatch vs JAX reference"

    print("KERNEL_OK")
</pallas_src>

<mosaic_0001>
module attributes {stable_mosaic.version = 11 : i64} {
  func.func @residual_block_kernel(%arg0: i32, %arg1: memref<8x32xf32, #tpu.memory_space<vmem>>, %arg2: memref<32x32xbf16, #tpu.memory_space<vmem>>, %arg3: memref<1x32xf32, #tpu.memory_space<vmem>>, %arg4: memref<32x32xbf16, #tpu.memory_space<vmem>>, %arg5: memref<1x32xf32, #tpu.memory_space<vmem>>, %arg6: memref<8x32xf32, #tpu.memory_space<vmem>>) attributes {dimension_semantics = [#tpu.dimension_semantics<parallel>], iteration_bounds = array<i64: 2>, scalar_prefetch = 0 : i64, scratch_operands = 0 : i64, tpu.core_type = #tpu.core_type<tc>, window_params = [{transform_indices = @transform_0, window_bounds = array<i64: 8, 32>}, {pipeline_mode = #tpu.pipeline_mode<synchronous>, transform_indices = @transform_1, window_bounds = array<i64: 32, 32>}, {pipeline_mode = #tpu.pipeline_mode<synchronous>, transform_indices = @transform_2, window_bounds = array<i64: 1, 32>}, {pipeline_mode = #tpu.pipeline_mode<synchronous>, transform_indices = @transform_3, window_bounds = array<i64: 32, 32>}, {pipeline_mode = #tpu.pipeline_mode<synchronous>, transform_indices = @transform_4, window_bounds = array<i64: 1, 32>}, {transform_indices = @transform_5, window_bounds = array<i64: 8, 32>}]} {
    %c0 = arith.constant 0 : index
    %c0_0 = arith.constant 0 : index
    %0 = vector.load %arg1[%c0, %c0_0] : memref<8x32xf32, #tpu.memory_space<vmem>>, vector<8x32xf32>
    %1 = arith.truncf %0 : vector<8x32xf32> to vector<8x32xbf16>
    %c0_1 = arith.constant 0 : index
    %c0_2 = arith.constant 0 : index
    %2 = vector.load %arg2[%c0_1, %c0_2] : memref<32x32xbf16, #tpu.memory_space<vmem>>, vector<32x32xbf16>
    %cst = arith.constant dense<0.000000e+00> : vector<8x32xf32>
    %3 = tpu.matmul %1, %2, %cst {dimension_numbers = #tpu.dot_dimension_numbers<[1], [0], [0], [1], [0, 0, 1, 1], [], []>} : vector<8x32xbf16>, vector<32x32xbf16>, vector<8x32xf32> -> vector<8x32xf32>
    %c0_3 = arith.constant 0 : index
    %c0_4 = arith.constant 0 : index
    %4 = vector.load %arg3[%c0_3, %c0_4] : memref<1x32xf32, #tpu.memory_space<vmem>>, vector<1x32xf32>
    %5 = vector.broadcast %4 : vector<1x32xf32> to vector<8x32xf32>
    %6 = arith.addf %3, %5 : vector<8x32xf32>
    %cst_5 = arith.constant 0.000000e+00 : f32
    %7 = vector.broadcast %cst_5 : f32 to vector<8x32xf32>
    %8 = arith.maximumf %6, %7 : vector<8x32xf32>
    %9 = arith.truncf %8 : vector<8x32xf32> to vector<8x32xbf16>
    %c0_6 = arith.constant 0 : index
    %c0_7 = arith.constant 0 : index
    %10 = vector.load %arg4[%c0_6, %c0_7] : memref<32x32xbf16, #tpu.memory_space<vmem>>, vector<32x32xbf16>
    %cst_8 = arith.constant dense<0.000000e+00> : vector<8x32xf32>
    %11 = tpu.matmul %9, %10, %cst_8 {dimension_numbers = #tpu.dot_dimension_numbers<[1], [0], [0], [1], [0, 0, 1, 1], [], []>} : vector<8x32xbf16>, vector<32x32xbf16>, vector<8x32xf32> -> vector<8x32xf32>
    %c0_9 = arith.constant 0 : index
    %c0_10 = arith.constant 0 : index
    %12 = vector.load %arg1[%c0_9, %c0_10] : memref<8x32xf32, #tpu.memory_space<vmem>>, vector<8x32xf32>
    %13 = arith.addf %12, %11 : vector<8x32xf32>
    %c0_11 = arith.constant 0 : index
    %c0_12 = arith.constant 0 : index
    %14 = vector.load %arg5[%c0_11, %c0_12] : memref<1x32xf32, #tpu.memory_space<vmem>>, vector<1x32xf32>
    %15 = vector.broadcast %14 : vector<1x32xf32> to vector<8x32xf32>
    %16 = arith.addf %13, %15 : vector<8x32xf32>
    %c0_13 = arith.constant 0 : index
    %c0_14 = arith.constant 0 : index
    %17 = vector.load %arg6[%c0_13, %c0_14] : memref<8x32xf32, #tpu.memory_space<vmem>>, vector<8x32xf32>
    tpu.vector_store %arg6[%c0_13, %c0_14], %16 {strides = array<i32>} : memref<8x32xf32, #tpu.memory_space<vmem>>, vector<8x32xf32>,
    return
  }
  func.func @transform_0(%arg0: i32) -> (i32, i32) {
    %c0_i32 = arith.constant 0 : i32
    %c0_i32_0 = arith.constant 0 : i32
    return %arg0, %c0_i32 : i32, i32
  }
  func.func @transform_1(%arg0: i32) -> (i32, i32) {
    %c0_i32 = arith.constant 0 : i32
    %c0_i32_0 = arith.constant 0 : i32
    %c0_i32_1 = arith.constant 0 : i32
    return %c0_i32, %c0_i32_0 : i32, i32
  }
  func.func @transform_2(%arg0: i32) -> (i32, i32) {
    %c0_i32 = arith.constant 0 : i32
    %c0_i32_0 = arith.constant 0 : i32
    %c0_i32_1 = arith.constant 0 : i32
    return %c0_i32, %c0_i32_0 : i32, i32
  }
  func.func @transform_3(%arg0: i32) -> (i32, i32) {
    %c0_i32 = arith.constant 0 : i32
    %c0_i32_0 = arith.constant 0 : i32
    %c0_i32_1 = arith.constant 0 : i32
    return %c0_i32, %c0_i32_0 : i32, i32
  }
  func.func @transform_4(%arg0: i32) -> (i32, i32) {
    %c0_i32 = arith.constant 0 : i32
    %c0_i32_0 = arith.constant 0 : i32
    %c0_i32_1 = arith.constant 0 : i32
    return %c0_i32, %c0_i32_0 : i32, i32
  }
  func.func @transform_5(%arg0: i32) -> (i32, i32) {
    %c0_i32 = arith.constant 0 : i32
    %c0_i32_0 = arith.constant 0 : i32
    return %arg0, %c0_i32 : i32, i32
  }
}

</mosaic_0001>

<bundles_post_ra>
// kernel: tpu_custom_call.1
= control target key start
LH: loop header
LB: loop body
LE: loop exit
PB: predicated region body
PF: predicated region fallthrough
CT: control target
= control target key end

     0   :  { %10 = vsyncpa [#allocation3], 0  ;;  %s1012_s0 = inlined_call_operand.hbm [shape: f32[16,32], index: 0, kind: input, shape index: {}]   ;;  %s1013_s1 = inlined_call_operand.hbm [shape: bf16[32,32], index: 1, kind: input, shape index: {}]   ;;  %s1014_s2 = inlined_call_operand.vmem [shape: f32[1,32], index: 2, kind: input, shape index: {}]   ;;  %s1015_s3 = inlined_call_operand.hbm [shape: bf16[32,32], index: 3, kind: input, shape index: {}]   ;;  %s1016_s4 = inlined_call_operand.vmem [shape: f32[1,32], index: 4, kind: input, shape index: {}]   ;;  %s1017_s5 = inlined_call_operand.hbm [shape: f32[16,32], index: 5, kind: output, shape index: {}]  }
   0x1   :  { %12 = vsyncpa [#allocation3 + $0x1], 0 }
   0x2   :  { %13 = vsyncpa [#allocation6], 0 }
   0x3   :  { %14 = vsyncpa [#allocation4], 0 }
   0x4   :  { %16 = vsyncpa [#allocation4 + $0x1], 0  ;;  %s822_s18 = smov 0   ;;  %s824_s19 = smov 0  }
   0x5   :  { %s826_s20 = smov 0   ;;  %s828_s21 = smov 0  }
   0x6 LB: > { %s843_s22 = sadd.s32 4294967295, %s782_s21   ;;  %s513_s23 = sadd.s32 4294967294, %s782_s21   ;;  %s782_s21 = sphi %s828_s21, %s1039_s21   ;;  %s778_s20 = sphi %s826_s20, %s1038_s20   ;;  %s774_s19 = sphi %s824_s19, %s1037_s19   ;;  %s770_s18 = sphi %s822_s18, %s1036_s18  }
   0x7   : > { %p42_p0 = scmp.ne.s32.totalorder %s774_s19, %s770_s18  ;;  %p1018_p1 = scmp.eq.s32.totalorder %s843_s22, 0 }
   0x8   : > { %p156_p3 = scmp.eq.s32.totalorder %s513_s23, 1  ;;  %p514_p5 = scmp.ge.s32.totalorder %s782_s21, 1 }
   0x9   : > { %p852_p4 = por %p1018_p1, %p42_p0  ;;  %p163_p7 = scmp.lt.s32.totalorder %s782_s21, 3 }
   0xa   : > { %p857_p6 = por %p156_p3, %p42_p0  ;;  %s784_s27 = smov [#allocation5]  }
   0xb   : > { %s1022_s24 = scalar_select %p852_p4, 1, 0 }
   0xc   : > { %s1023_s25 = scalar_select %p857_p6, 1, 0 }
   0xd   : > { %p862_p8 = pnand %p514_p5, %p163_p7  ;;  %s175_s28 = sshll.u32 %s784_s27, 4  ;;  %s176_s28 = int_to_ptr.vmem [resolvable:$true] %s175_s28 }
   0xe   : > { %s785_s30 = smov [#allocation7]   ;;  %s645_s7 = scalar_lea.vmem %s176_s28, 256 }
   0xf   : > { %s1024_s26 = scalar_select %p862_p8, 1, 0 }
  0x10   : > { %p571_p9 = pneg %p862_p8  ;;  %s191_s6 = sshll.u32 %s785_s30, 4  ;;  %s192_s6 = int_to_ptr.vmem [resolvable:$true] %s191_s6 }
  0x11   : > { %p646_p13 = scmp.ne.s32.totalorder %s176_s28, %s645_s7  ;;  %p653_p5 = scmp.lt.s32.totalorder %s176_s28, %s176_s28 }
  0x12   : > { %p871_p11 = pnand %p571_p9, %p1018_p1  ;;  %p654_p7 = scmp.lt.s32.totalorder %s645_s7, %s645_s7 }
  0x14   : > { %p636_p12 = pneg %p871_p11  ;;  %p655_p10 = por %p654_p7, %p653_p5 }
  0x16   : > { %p648_p0 = pnand %p646_p13, %p636_p12 }
  0x18   : > { %p649_p3 = pneg %p648_p0 }
  0x1a   : > { %p656_p9 = pnand %p655_p10, %p649_p3 }
  0x1c   : > { %659 = shalt.err (!%p656_p9)
}
  0x1d   : > { %s786_s8 = smov 64   ;;  %s787_s9 = smov 4  }
  0x1e   : > { %574 = dma.hbm_to_vmem [thread:$0]  (!%p871_p11), %s1013_s1, 256, %s176_s28, [#allocation6], %s786_s8, %s786_s8, %s787_s9  }
  0x1f   : > { %s671_s12 = scalar_lea.vmem %s192_s6, 256  ;;  %p679_p2 = scmp.lt.s32.totalorder %s192_s6, %s192_s6 }
  0x20   : > { %p672_p1 = scmp.ne.s32.totalorder %s192_s6, %s671_s12  ;;  %p680_p6 = scmp.lt.s32.totalorder %s671_s12, %s671_s12 }
  0x22   : > { %p674_p13 = pnand %p672_p1, %p636_p12  ;;  %p681_p5 = por %p680_p6, %p679_p2 }
  0x24   : > { %p675_p0 = pneg %p674_p13 }
  0x26   : > { %p682_p10 = pnand %p681_p5, %p675_p0 }
  0x28   : > { %685 = shalt.err (!%p682_p10)
}
  0x29   : > { %577 = dma.hbm_to_vmem [thread:$0]  (!%p871_p11), %s1015_s3, 256, %s192_s6, [#allocation6], %s786_s8, %s786_s8, %s787_s9  }
  0x2a   : > { %s894_s15 = sadd.s32 1, %s782_s21   ;;  %s29_s16 = sadd.s32 1, %s778_s20 }
  0x2b   : > { %s26_s17 = ssub.s32 %s782_s21, %s894_s15  ;;  %p36_p1 = scmp.ne.s32.totalorder %s778_s20, %s774_s19 }
  0x2c   : > { %p27_p2 = scmp.eq.s32.totalorder %s26_s17, 0  ;;  %p37_p6 = scmp.eq.s32.totalorder %s782_s21, 0 }
  0x2d   : > { %p1026_p12 = scmp.eq.s32.totalorder %s843_s22, 1  ;;  %p588_p7 = scmp.lt.s32.totalorder %s782_s21, 2 }
  0x2e   : > { %s910_s27 = scalar_select %p27_p2, %s778_s20, %s29_s16  }
  0x2f   : > { %p904_p3 = por %p1026_p12, %p36_p1  ;;  %p38_p9 = por %p37_p6, %p36_p1 }
  0x30   : > { %s208_s28 = sand.u32 1, %s778_s20   ;;  %s519_s30 = sshll.u32 %s782_s21, 7 }
  0x31   : > { %s1027_s23 = scalar_select %p904_p3, 1, 0 }
  0x32   : > { %s518_s29 = sshll.u32 %s208_s28, 3  ;;  %s917_s8 = scalar_lea.hbm %s1012_s0, %s519_s30 }
  0x33   : > { %s212_s9 = scalar_lea.vmem [#allocation2], %s518_s29  ;;  %p919_p11 = pnand %p588_p7, %p38_p9 }
  0x34   : > { %s219_s10 = sshll.u32 %s212_s9, 4  ;;  %s209_s12 = scalar_lea.sflag [#allocation3], %s208_s28  ;;  %s220_s10 = int_to_ptr.vmem [resolvable:$true] %s219_s10 }
  0x35   : > { %s686_s13 = scalar_lea.hbm %s917_s8, 128  ;;  %p688_p0 = pneg %p919_p11 }
  0x36   : > { %p687_p13 = scmp.ne.s32.totalorder %s917_s8, %s686_s13  ;;  %s691_s17 = scalar_lea.hbm %s1012_s0, 256 }
  0x37   : > { %p692_p1 = scmp.lt.s32.totalorder %s917_s8, %s1012_s0  ;;  %p693_p2 = scmp.lt.s32.totalorder %s691_s17, %s686_s13 }
  0x38   : > { %p689_p5 = pnand %p688_p0, %p687_p13 }
  0x39   : > { %p694_p6 = por %p693_p2, %p692_p1 }
  0x3a   : > { %p690_p10 = pneg %p689_p5 }
  0x3c   : > { %p695_p12 = pnand %p694_p6, %p690_p10 }
  0x3e   : > { %698 = shalt.err (!%p695_p12)
}
  0x3f   : > { %s699_s6 = scalar_lea.vmem %s220_s10, 128  ;;  %s788_s28 = smov [#allocation2]  }
  0x40   : > { %p700_p7 = scmp.ne.s32.totalorder %s220_s10, %s699_s6  ;;  %s704_s7 = sshll.u32 %s788_s28, 4  ;;  %s705_s7 = int_to_ptr.vmem [resolvable:$false] %s704_s7 }
  0x41   : > { %s706_s9 = scalar_lea.vmem %s705_s7, 256  ;;  %p707_p13 = scmp.lt.s32.totalorder %s220_s10, %s705_s7 }
  0x42   : > { %p702_p9 = pnand %p700_p7, %p688_p0  ;;  %p708_p5 = scmp.lt.s32.totalorder %s706_s9, %s699_s6 }
  0x44   : > { %p703_p3 = pneg %p702_p9  ;;  %p709_p4 = por %p708_p5, %p707_p13 }
  0x46   : > { %p710_p8 = pnand %p709_p4, %p703_p3 }
  0x48   : > { %713 = shalt.err (!%p710_p8)
}
  0x49   : > { %581 = dma.hbm_to_vmem [thread:$0]  (!%p919_p11), %s917_s8, 128, %s220_s10, %s209_s12  }
  0x4a   : > { %p1029_p10 = scmp.ne.s32.totalorder %s1024_s26, 0 }
  0x4b   : > { %s940_s13 = sand.u32 (!%p1029_p10), 1, %s774_s19   ;;  %p1030_p4 = scmp.ne.s32.totalorder (!%p1029_p10), %s1022_s24, 0 }
  0x4c   : > { %228 = sbr.rel (%p1029_p10) target bundleno = 505 (0x1f9), region = 40  ;;  %s521_s14 = sshll.u32 (!%p1029_p10), %s940_s13, 3 }
  0x4d   : > { %s231_s16 = scalar_lea.sflag (!%p1029_p10), [#allocation3], %s940_s13  ;;  %s234_s17 = scalar_lea.vmem (!%p1029_p10), [#allocation2], %s521_s14 }
  0x51   : > { %757 = dma.done.wait (%p1030_p4), %s231_s16, 128  }
  0x52   : > { %759 = vsyncadd (%p1030_p4), %s231_s16, 4294967168  ;;  %p1031_p8 = scmp.eq.s32.totalorder %s843_s22, 0 }
  0x54   : > { %761 = dma.done.wait (%p1031_p8), [#allocation6], 512   ;;  %p1032_p3 = pmov %p1031_p8 }
  0x55   : > { %v789_v0 = vmov 0.0   ;;  %vm790_vm0 = vmmov 0   ;;  %v630_v1 = vld [vmem:[#allocation5 + $0x8] sm:$0xff]   ;;  %v631_v2 = vld [vmem:[#allocation5] sm:$0xff]   ;;  %v270_v3 = vld [vmem:[%s234_s17] sm:$0xff]  ;;  %vm295_vm1 = vcmask 261120  }
  0x56   : > { %763 = vsyncadd (%p1032_p3), [#allocation6], 4294966784  ;;  %543 = vmatprep.subr.bf16.mxu0 %v789_v0  ;;  %547 = vmatprep.mubr.msk.bf16.mxu0 %vm790_vm0, %v789_v0  ;;  %v271_v4 = vpack.c.bf16 %v270_v3, %v270_v3  ;;  %v632_v5 = vld [vmem:[#allocation7 + $0x8] sm:$0xff]   ;;  %v633_v6 = vld [vmem:[#allocation7] sm:$0xff]   ;;  %s534_s11 = sshll.u32 %s843_s22, 7  ;;  %s268_s12 = scalar_lea.vmem [#allocation8], %s521_s14 }
  0x57   : > { %551 = vmatprep.subr.bf16.mxu1 %v789_v0  ;;  %555 = vmatprep.mubr.msk.bf16.mxu1 %vm790_vm0, %v789_v0  ;;  %v525_v7 = vld [vmem:[%s1014_s2] ss:$0 sm:$0xff]  ;;  %s424_s30 = sshll.u32 %s268_s12, 4  ;;  %s968_s28 = scalar_lea.hbm %s1017_s5, %s534_s11  ;;  %s970_s30 = int_to_ptr.vmem [resolvable:$true] %s424_s30 }
  0x58   : > { %544 = vmatpush3.bf16.msra.mxu0 %v630_v1  ;;  %552 = vmatpush3.bf16.msra.mxu1 %v632_v5  ;;  %v532_v16 = vld [vmem:[%s1016_s4] ss:$0 sm:$0xff]  ;;  %s411_s22 = scalar_lea.sflag [#allocation4], %s940_s13  ;;  %s714_s7 = scalar_lea.vmem %s970_s30, 128 }
  0x59   : > { %545 = vmatprep.subr.bf16.mxu0 %v789_v0  ;;  %553 = vmatprep.subr.bf16.mxu1 %v789_v0  ;;  %p715_p11 = scmp.ne.s32.totalorder %s970_s30, %s714_s7  ;;  %p1033_p0 = scmp.ne.s32.totalorder %s1027_s23, 0 }
  0x5a   : > { %s791_s9 = smov [#allocation8]  }
  0x5b   : > { %p716_p1 = pnand %p715_p11, %p1033_p0  ;;  %s718_s14 = sshll.u32 %s791_s9, 4  ;;  %s719_s14 = int_to_ptr.vmem [resolvable:$false] %s718_s14 }
  0x5c   : > { %546 = vmatpush3.bf16.msra.mxu0 %v631_v2  ;;  %554 = vmatpush3.bf16.msra.mxu1 %v633_v6  ;;  %s720_s16 = scalar_lea.vmem %s719_s14, 256  ;;  %p721_p6 = scmp.lt.s32.totalorder %s970_s30, %s719_s14 }
  0x5d   : > { %p717_p2 = pneg %p716_p1  ;;  %p722_p12 = scmp.lt.s32.totalorder %s720_s16, %s714_s7 }
  0x5f   : > { %548 = vmatmul.mubr.msk.bf16.vlgmr.msra.gmra.mxu0 %vm295_vm1, %v271_v4  ;;  %p723_p7 = por %p722_p12, %p721_p6 }
  0x61   : > { %p724_p9 = pnand %p723_p7, %p717_p2 }
 0x11f   : > { %v333_v8 = vpop.f32.mrf.mxu0 }
 0x120   : > { %v334_v9 = vadd.f32 %v525_v7, %v333_v8 }
 0x121   : > { %v549_v10 = vpop.f32.mrf.mxu0 }
 0x122   : > { %v339_v11 = vmax.f32 %v334_v9, 0.0 }
 0x123   : > { %v336_v12 = vpop.f32.mrf.mxu0 }
 0x124   : > { %v340_v13 = vpack.c.bf16 %v339_v11, %v339_v11 }
 0x125   : > { %v550_v14 = vpop.f32.mrf.mxu0 }
 0x126   : > { %556 = vmatmul.mubr.msk.bf16.vlgmr.msra.gmra.mxu1 %vm295_vm1, %v340_v13 }
 0x1e6   : > { %v394_v15 = vpop.f32.mrf.mxu1 }
 0x1e7   : > { %v400_v17 = vadd.f32 %v394_v15, %v270_v3 }
 0x1e8   : > { %v557_v18 = vpop.f32.mrf.mxu1 }
 0x1e9   : > { %v408_v19 = vadd.f32 %v532_v16, %v400_v17 }
 0x1ea   : > { %v397_v20 = vpop.f32.mrf.mxu1 }
 0x1eb   : > { %409 = vst.msk [vmem:[%s268_s12] sm:$0xff] %vm295_vm1, %v408_v19 }
 0x1ec   : > { %v558_v21 = vpop.f32.mrf.mxu1 }
 0x1ed   : > { %727 = shalt.err (!%p724_p9)
}
 0x1ee   : > { %s728_s17 = scalar_lea.hbm %s968_s28, 128  ;;  %s732_s26 = scalar_lea.hbm %s1017_s5, 256 }
 0x1ef   : > { %p729_p13 = scmp.ne.s32.totalorder %s968_s28, %s728_s17  ;;  %p733_p4 = scmp.lt.s32.totalorder %s968_s28, %s1017_s5 }
 0x1f0   : > { %p734_p8 = scmp.lt.s32.totalorder %s732_s26, %s728_s17 }
 0x1f1   : > { %p730_p5 = pnand %p729_p13, %p1033_p0 }
 0x1f2   : > { %p735_p3 = por %p734_p8, %p733_p4 }
 0x1f3   : > { %p731_p10 = pneg %p730_p5 }
 0x1f5   : > { %p736_p11 = pnand %p735_p3, %p731_p10 }
 0x1f7   : > { %739 = shalt.err (!%p736_p11)
}
 0x1f8   : > { %569 = dma.vmem_to_hbm [thread:$0]  (%p1033_p0), %s970_s30, 128, %s968_s28, %s411_s22  }
 0x1f9 PF: > { %s436_s11 = sand.u32 1, %s770_s18   ;;  %p1034_p1 = scmp.ne.s32.totalorder %s1023_s25, 0 }
 0x1fa   : > { %p1035_p2 = scmp.ge.s32.totalorder %s782_s21, 2  ;;  %s437_s12 = scalar_lea.sflag [#allocation4], %s436_s11 }
 0x1fc   : > { %p583_p6 = pnand %p1035_p2, %p1034_p1 }
 0x1fe   : > { %p584_p12 = pneg %p583_p6 }
 0x200   : > { %765 = dma.done.wait (%p584_p12), %s437_s12, 128  }
 0x201   : > { %767 = vsyncadd (%p584_p12), %s437_s12, 4294967168  ;;  %p19_p7 = scmp.ge.s32.totalorder %s894_s15, 4   ;;  %s1036_s18 = smov %s774_s19 }
 0x202   : > { %s1037_s19 = smov %s778_s20  ;;  %s1038_s20 = smov %s910_s27 }
 0x203   : > { %s1039_s21 = smov %s894_s15  ;;  %21 = sbr.rel (!%p19_p7) target bundleno = 6 (0x6), region = 93 }
 0x208   :  { %442 = vsyncpa [#allocation3], 1 }
 0x209   :  { %444 = vsyncpa [#allocation3 + $0x1], 1 }
 0x20a   :  { %445 = vsyncpa [#allocation6], 1 }
 0x20b   :  { %446 = vsyncpa [#allocation4], 1 }
 0x20c   :  { %448 = vsyncpa [#allocation4 + $0x1], 1 }

</bundles_post_ra>
